<compile_context>
chip_gen: v7x
topology: tpu7x:2x2x1
jax: 0.10.0
libtpu: 0.0.40
codegen_flags: <defaults>
</compile_context>

<pallas_src>
import functools

import jax
import jax.numpy as jnp
from jax.experimental import pallas as pl
from jax.experimental.pallas import tpu as pltpu


def _label_smooth_ce_kernel(pred_ref, label_ref, out_ref, *,
                            smoothing, n_total, tile_n, mask_rows):
    """One N-tile of label-smoothing cross-entropy.

    pred_ref : (TILE_N, C)     model dtype (cast to f32 in-kernel)
    label_ref: (PADDED_N, 1)   int32, resident across the whole grid
    out_ref  : (8, 128)        f32 — tile partial sum splatted over the block
    """
    i = pl.program_id(0)
    x = pred_ref[...].astype(jnp.float32)                       # (TILE_N, C)
    tn, c = x.shape

    start = i * tile_n
    lbl = label_ref[pl.ds(pl.multiple_of(start, tile_n), tile_n), :]   # (TILE_N, 1)

    # logsumexp(x) per row; exp-sum reduced on the MXU (dot with a ones column).
    ones_col = jnp.ones((c, 1), jnp.float32)
    m = jnp.max(x, axis=1, keepdims=True)                       # (TILE_N, 1)
    p = jnp.exp(x - m)                                          # (TILE_N, C), EUP
    denom = jnp.dot(p, ones_col, preferred_element_type=jnp.float32)
    lse = m + jnp.log(denom)                                    # (TILE_N, 1)

    # Fused smoothed-target weighted sum:
    #   loss_row = lse - sum(coef * x),  coef = (1-s)+s/C at label, s/C elsewhere
    # (valid because the smoothed one-hot sums to 1).
    base = smoothing / c
    class_ids = jax.lax.broadcasted_iota(jnp.int32, (tn, c), 1)
    coef = jnp.where(class_ids == lbl, 1.0 - smoothing + base, base)
    weighted = jnp.dot(coef * x, ones_col, preferred_element_type=jnp.float32)

    loss_rows = lse - weighted                                  # (TILE_N, 1)

    if mask_rows:
        # Ragged last tile: padded rows hold stale/garbage VMEM data; the select is
        # NaN-safe and zeroes their contribution. Skipped when N % TILE_N == 0.
        row_ids = start + jax.lax.broadcasted_iota(jnp.int32, (tn, 1), 0)
        loss_rows = jnp.where(row_ids < n_total, loss_rows, 0.0)

    tile_sum = jnp.sum(loss_rows)
    # Lane-dense unmasked (8, 128) store; wrapper reads [0, 0] of each tile block.
    out_ref[...] = jnp.broadcast_to(tile_sum, (8, 128)).astype(jnp.float32)


def label_smooth_ce_loss(pred, label, smoothing=0.1, reduction="mean", tile_n=None):
    """Pallas implementation of LabelSmoothCELoss.forward."""
    assert reduction in ("mean", "sum"), "only reduction='mean'/'sum' implemented"
    n, c = pred.shape
    itemsize = jnp.dtype(pred.dtype).itemsize

    # Sublane alignment for the packed dtype: 8 rows f32, 16 bf16, 32 int8/fp8.
    row_align = max(8, 32 // max(itemsize, 1))

    if tile_n is None:
        # Working-set target ~20 MiB: double-buffered input rows + ~4 f32 full-tile
        # temporaries (upcast, exp, coef, coef*x).
        per_row = 2 * c * itemsize + 4 * c * 4
        budget = 20 * 1024 * 1024
        tile_n = max(row_align, min(4096, budget // max(per_row, 1)))
    tile_n = max(row_align, (int(tile_n) // row_align) * row_align)

    # Keep >= 2 grid tiles when possible (v7x megacore: both TCs busy), and never
    # exceed the aligned problem size.
    n_pad_min = pl.cdiv(n, row_align) * row_align
    if n_pad_min >= 2 * row_align:
        half = pl.cdiv(pl.cdiv(n, 2), row_align) * row_align
        tile_n = min(tile_n, half)
    tile_n = min(tile_n, n_pad_min)

    num_tiles = pl.cdiv(n, tile_n)
    padded_n = num_tiles * tile_n
    mask_rows = (n % tile_n) != 0

    # Labels: one resident int32 block, padded so in-kernel pl.ds slices never go OOB.
    label2d = label.astype(jnp.int32).reshape(n, 1)
    if padded_n != n:
        label2d = jnp.pad(label2d, ((0, padded_n - n), (0, 0)))

    kernel = functools.partial(
        _label_smooth_ce_kernel,
        smoothing=float(smoothing),
        n_total=n,
        tile_n=tile_n,
        mask_rows=mask_rows,
    )

    # Rough VMEM estimate; raise the scoped limit only when it exceeds the smallest
    # default budget (v5e 16 MiB). 48 MiB fits every generation's physical VMEM.
    est_bytes = tile_n * (2 * c * itemsize + 4 * c * 4) + padded_n * 4 + 4 * 8 * 128 * 4
    vmem_limit = (48 * 1024 * 1024) if est_bytes > (12 * 1024 * 1024) else None

    partials = pl.pallas_call(
        kernel,
        out_shape=jax.ShapeDtypeStruct((num_tiles * 8, 128), jnp.float32),
        grid=(num_tiles,),
        in_specs=[
            # pred streamed in model dtype (cast to f32 inside the kernel).
            pl.BlockSpec((tile_n, c), lambda i: (i, 0)),
            # labels: constant index_map -> fetched once, resident across the grid.
            pl.BlockSpec((padded_n, 1), lambda i: (0, 0)),
        ],
        out_specs=pl.BlockSpec((8, 128), lambda i: (i, 0)),
        compiler_params=pltpu.CompilerParams(
            dimension_semantics=("parallel",),
            vmem_limit_bytes=vmem_limit,
        ),
    )(pred, label2d)

    tile_sums = partials.reshape(num_tiles, 8, 128)[:, 0, 0]
    total = jnp.sum(tile_sums)
    if reduction == "mean":
        return total / n
    return total


def _reference(pred, label, smoothing=0.1):
    # Pure-JAX reference mirroring the PyTorch forward exactly.
    p = jax.nn.softmax(pred.astype(jnp.float32), axis=1)
    one_hot = jax.nn.one_hot(label, pred.shape[1], dtype=jnp.float32)
    smoothed = (1.0 - smoothing) * one_hot + smoothing / pred.shape[1]
    loss = jnp.sum(-jnp.log(p) * smoothed, axis=1)
    return jnp.mean(loss)


if __name__ == "__main__":
    key = jax.random.PRNGKey(0)
    k1, k2, k3, k4, k5, k6 = jax.random.split(key, 6)

    # Small single-tile case (matches the module's (N, C) logits layout).
    N, C = 8, 16
    pred = jax.random.normal(k1, (N, C), dtype=jnp.float32)
    label = jax.random.randint(k2, (N,), 0, C, dtype=jnp.int32)
    loss = jax.block_until_ready(label_smooth_ce_loss(pred, label, smoothing=0.1))
    ref = _reference(pred, label, smoothing=0.1)
    assert jnp.allclose(loss, ref, atol=1e-5, rtol=1e-5), (loss, ref)

    # Multi-tile case with a ragged last tile (exercises grid + row masking).
    N2, C2 = 40, 128
    pred2 = jax.random.normal(k3, (N2, C2), dtype=jnp.float32)
    label2 = jax.random.randint(k4, (N2,), 0, C2, dtype=jnp.int32)
    loss2 = jax.block_until_ready(
        label_smooth_ce_loss(pred2, label2, smoothing=0.1, tile_n=16)
    )
    ref2 = _reference(pred2, label2, smoothing=0.1)
    assert jnp.allclose(loss2, ref2, atol=1e-5, rtol=1e-5), (loss2, ref2)

    # bf16 logits: exercises in-kernel upcast and the 16-row sublane alignment.
    N3, C3 = 40, 128
    pred3 = jax.random.normal(k5, (N3, C3), dtype=jnp.float32).astype(jnp.bfloat16)
    label3 = jax.random.randint(k6, (N3,), 0, C3, dtype=jnp.int32)
    loss3 = jax.block_until_ready(label_smooth_ce_loss(pred3, label3, smoothing=0.1))
    ref3 = _reference(pred3, label3, smoothing=0.1)
    assert jnp.allclose(loss3, ref3, atol=1e-4, rtol=1e-4), (loss3, ref3)

    print("KERNEL_OK")
</pallas_src>

<mosaic_0001>
module attributes {stable_mosaic.version = 11 : i64} {
  func.func @_label_smooth_ce_kernel(%arg0: i32, %arg1: memref<8x16xf32, #tpu.memory_space<vmem>>, %arg2: memref<8x1xi32, #tpu.memory_space<vmem>>, %arg3: memref<8x128xf32, #tpu.memory_space<vmem>>) attributes {dimension_semantics = [#tpu.dimension_semantics<parallel>], iteration_bounds = array<i64: 1>, scalar_prefetch = 0 : i64, scratch_operands = 0 : i64, tpu.core_type = #tpu.core_type<tc>, window_params = [{transform_indices = @transform_0, window_bounds = array<i64: 8, 16>}, {pipeline_mode = #tpu.pipeline_mode<synchronous>, transform_indices = @transform_1, window_bounds = array<i64: 8, 1>}, {transform_indices = @transform_2, window_bounds = array<i64: 8, 128>}]} {
    %c0 = arith.constant 0 : index
    %c0_0 = arith.constant 0 : index
    %0 = vector.load %arg1[%c0, %c0_0] : memref<8x16xf32, #tpu.memory_space<vmem>>, vector<8x16xf32>
    %c8_i32 = arith.constant 8 : i32
    %1 = arith.muli %arg0, %c8_i32 : i32
    %2 = tpu.assume_multiple %1, 8 : i32
    %3 = arith.index_cast %2 : i32 to index
    %c0_1 = arith.constant 0 : index
    %4 = vector.load %arg2[%3, %c0_1] : memref<8x1xi32, #tpu.memory_space<vmem>>, vector<8x1xi32>
    %cst = arith.constant 1.000000e+00 : f32
    %5 = vector.broadcast %cst : f32 to vector<16x1xf32>
    %cst_2 = arith.constant dense<0xFF800000> : vector<8xf32>
    %6 = vector.multi_reduction <maximumf>, %0, %cst_2 [1] : vector<8x16xf32> to vector<8xf32>
    %7 = vector.shape_cast %6 : vector<8xf32> to vector<8x1xf32>
    %8 = vector.broadcast %7 : vector<8x1xf32> to vector<8x16xf32>
    %9 = arith.subf %0, %8 : vector<8x16xf32>
    %10 = math.exp %9 : vector<8x16xf32>
    %cst_3 = arith.constant dense<0.000000e+00> : vector<8x1xf32>
    %11 = tpu.matmul %10, %5, %cst_3 {dimension_numbers = #tpu.dot_dimension_numbers<[1], [0], [0], [1], [0, 0, 1, 1], [], []>} : vector<8x16xf32>, vector<16x1xf32>, vector<8x1xf32> -> vector<8x1xf32>
    %12 = math.log %11 : vector<8x1xf32>
    %13 = arith.addf %7, %12 : vector<8x1xf32>
    %14 = tpu.iota {dimensions = array<i32: 1>} : vector<8x16xi32>
    %15 = vector.broadcast %4 : vector<8x1xi32> to vector<8x16xi32>
    %16 = arith.cmpi eq, %14, %15 : vector<8x16xi32>
    %cst_4 = arith.constant 9.062500e-01 : f32
    %cst_5 = arith.constant 6.250000e-03 : f32
    %17 = vector.broadcast %cst_4 : f32 to vector<8x16xf32>
    %18 = vector.broadcast %cst_5 : f32 to vector<8x16xf32>
    %19 = arith.select %16, %17, %18 : vector<8x16xi1>, vector<8x16xf32>
    %20 = arith.mulf %19, %0 : vector<8x16xf32>
    %cst_6 = arith.constant dense<0.000000e+00> : vector<8x1xf32>
    %21 = tpu.matmul %20, %5, %cst_6 {dimension_numbers = #tpu.dot_dimension_numbers<[1], [0], [0], [1], [0, 0, 1, 1], [], []>} : vector<8x16xf32>, vector<16x1xf32>, vector<8x1xf32> -> vector<8x1xf32>
    %22 = arith.subf %13, %21 : vector<8x1xf32>
    %23 = vector.shape_cast %22 : vector<8x1xf32> to vector<1x8x1xf32>
    %cst_7 = arith.constant dense<0.000000e+00> : vector<1xf32>
    %24 = vector.multi_reduction <add>, %23, %cst_7 [1, 2] : vector<1x8x1xf32> to vector<1xf32>
    %25 = vector.shape_cast %24 : vector<1xf32> to vector<1x1x1xf32>
    %26 = vector.extract %25[0, 0, 0] : f32 from vector<1x1x1xf32>
    %27 = vector.broadcast %26 : f32 to vector<8x128xf32>
    %c0_8 = arith.constant 0 : index
    %c0_9 = arith.constant 0 : index
    %28 = vector.load %arg3[%c0_8, %c0_9] : memref<8x128xf32, #tpu.memory_space<vmem>>, vector<8x128xf32>
    tpu.vector_store %arg3[%c0_8, %c0_9], %27 {strides = array<i32>} : memref<8x128xf32, #tpu.memory_space<vmem>>, vector<8x128xf32>,
    return
  }
  func.func @transform_0(%arg0: i32) -> (i32, i32) {
    %c0_i32 = arith.constant 0 : i32
    %c0_i32_0 = arith.constant 0 : i32
    return %arg0, %c0_i32 : i32, i32
  }
  func.func @transform_1(%arg0: i32) -> (i32, i32) {
    %c0_i32 = arith.constant 0 : i32
    %c0_i32_0 = arith.constant 0 : i32
    %c0_i32_1 = arith.constant 0 : i32
    return %c0_i32, %c0_i32_0 : i32, i32
  }
  func.func @transform_2(%arg0: i32) -> (i32, i32) {
    %c0_i32 = arith.constant 0 : i32
    %c0_i32_0 = arith.constant 0 : i32
    return %arg0, %c0_i32 : i32, i32
  }
}

</mosaic_0001>

<bundles_post_ra>
// kernel: tpu_custom_call.1
= control target key start
LH: loop header
LB: loop body
LE: loop exit
PB: predicated region body
PF: predicated region fallthrough
CT: control target
= control target key end

     0   :  { %vm16_vm0 = vcmask 130048   ;;  %s315_s0 = inlined_call_operand.vmem [shape: f32[8,16], index: 0, kind: input, shape index: {}]   ;;  %s316_s1 = inlined_call_operand.vmem [shape: s32[8,1], index: 1, kind: input, shape index: {}]   ;;  %s317_s2 = inlined_call_operand.hbm [shape: f32[8,128], index: 2, kind: output, shape index: {}]  }
   0x1   :  { %v12_v0 = vld [vmem:[%s315_s0] sm:$0xff] }
   0x2   :  { %7 = vsyncpa [#allocation3], 0  ;;  %v17_v1 = vsel %vm16_vm0, %v12_v0, -inf  ;;  %v272_v2 = vmov 0   ;;  %v15_v3 = vld [vmem:[%s316_s1] sm:$0xff]  ;;  %v273_v4 = vmov 0.0|0.0   ;;  %v99_v9 = vlaneseq }
   0x3   :  { %243 = vset.pattern.permute.xlu0 %v272_v2  ;;  %230 = vmatprep.subr.bf16.mxu0 %v273_v4  ;;  %vm274_vm1 = vmmov 0   ;;  %v275_v5 = vmov 0.0   ;;  %v276_v6 = vmov 1.0|1.0   ;;  %v277_v13 = vmov 0.00625  }
   0x4   :  { %18 = vmax.xlane.f32.xlu0 %v17_v1  ;;  %220 = vmatprep.mubr.msk.f32.mxu0 %vm274_vm1, %v275_v5  ;;  %v100_v11 = vand.u32 127, %v99_v9  ;;  %vm181_vm3 = vcmask 7168   ;;  %s278_s0 = smov [#allocation2]  }
   0x5   :  { %231 = vmatpush3.bf16.msra.mxu0 %v276_v6  ;;  %232 = vmatprep.subr.bf16.mxu1 %v273_v4  ;;  %s200_s1 = sshll.u32 %s278_s0, 4  ;;  %s201_s1 = int_to_ptr.vmem [resolvable:$true] %s200_s1 }
   0x6   :  { %233 = vmatpush3.bf16.msra.mxu1 %v276_v6  ;;  %227 = vmatprep.mubr.msk.f32.mxu1 %vm274_vm1, %v275_v5  ;;  %s248_s14 = scalar_lea.vmem %s201_s1, 128  ;;  %p253_p1 = scmp.lt.s32.totalorder %s201_s1, %s201_s1 }
   0x7   :  { %p249_p0 = scmp.ne.s32.totalorder %s201_s1, %s248_s14  ;;  %p254_p2 = scmp.lt.s32.totalorder %s248_s14, %s248_s14 }
   0x9   :  { %p255_p3 = por %p254_p2, %p253_p1 }
   0xb   :  { %p256_p4 = pnand %p255_p3, %p249_p0 }
  0x1a   :  { %102 = vperm.xlu0 %243, %v15_v3  }
  0x91   :  { %v19_v7 = vpop.xlane.xlu0 %18 }
  0x92   :  { %v20_v8 = vsub.f32 %v12_v0, %v19_v7 }
  0x94   :  { %v21_v10 = vmul.f32 1.442695, %v20_v8 }
  0x96   :  { %244 = vpow2.f32 %v21_v10 }
  0x99   :  { %v103_v12 = vpop.permute.xlu0 %102 }
  0x9a   :  { %vm104_vm2 = vcmp.eq.s32.totalorder %v100_v11, %v103_v12 }
  0x9b   :  { %v105_v14 = vsel %vm104_vm2, 0.90625, %v277_v13 }
  0x9c   :  { %v106_v15 = vmul.f32 %v105_v14, %v12_v0 }
  0x9e   :  { %228 = vmatmul.mubr.msk.f32.vlgmr.msra.gmra.mrb[0].mxu1 %vm16_vm0, %v106_v15 }
  0xa0   :  { %v245_v16 = vpop.eup %244 }
  0xa1   :  { %221 = vmatmul.mubr.msk.f32.vlgmr.msra.gmra.mrb[0].mxu0 %vm16_vm0, %v245_v16 }
 0x171   :  { %v176_v17 = vpop.f32.mrb[0].mxu1 }
 0x172   :  { %v229_v18 = vpop.f32.mrb[1].mxu1 }
 0x174   :  { %v92_v19 = vpop.f32.mrb[0].mxu0 }
 0x175   :  { %246 = vlog2.f32 %v92_v19  ;;  %v222_v20 = vpop.f32.mrb[1].mxu0 }
 0x17f   :  { %v247_v21 = vpop.eup %246 }
 0x180   :  { %v97_v22 = vmul.f32 0.6931472, %v247_v21 }
 0x182   :  { %v98_v23 = vadd.f32 %v97_v22, %v19_v7 }
 0x184   :  { %v180_v24 = vsub.f32 %v98_v23, %v176_v17 }
 0x186   :  { %v182_v25 = vsel %vm181_vm3, %v180_v24, 0.0 }
 0x187   :  { %183 = vadd.xlane.f32.xlu1 %v182_v25 }
 0x214   :  { %v184_v26 = vpop.xlane.xlu1 %183 }
 0x215   :  { %v185_v27 = vrot.slane %v184_v26, 4 }
 0x217   :  { %v186_v28 = vadd.f32 %v185_v27, %v184_v26 }
 0x219   :  { %v187_v29 = vrot.slane %v186_v28, 2 }
 0x21b   :  { %v188_v30 = vadd.f32 %v187_v29, %v186_v28 }
 0x21d   :  { %v189_v31 = vrot.slane %v188_v30, 1 }
 0x21f   :  { %v190_v32 = vadd.f32 %v189_v31, %v188_v30 }
 0x221   :  { %234 = vpush %v190_v32 }
 0x252   :  { %s235_s13 = spop %234 }
 0x253   :  { %v192_v33 = vstv %s235_s13 }
 0x254   :  { %193 = vst [vmem:[#allocation2] sm:$0xff] %v192_v33 }
 0x255   :  { %259 = shalt.err (!%p256_p4)
}
 0x256   :  { %s260_s17 = scalar_lea.hbm %s317_s2, 128 }
 0x257   :  { %p261_p5 = scmp.ne.s32.totalorder %s317_s2, %s260_s17  ;;  %p264_p6 = scmp.lt.u32.totalorder %s260_s17, %s317_s2 }
 0x259   :  { %p266_p7 = pnand %p264_p6, %p261_p5 }
 0x25b   :  { %269 = shalt.err (!%p266_p7)
}
 0x25c   :  { %203 = dma.vmem_to_hbm [thread:$0]  %s201_s1, 128, %s317_s2, [#allocation3]  }
 0x25d   :  { %270 = dma.done.wait [#allocation3], 128  }
 0x25e   :  { %271 = vsyncadd [#allocation3], 4294967168 }
 0x25f   :  { %207 = vsyncpa [#allocation3], 1 }

</bundles_post_ra>
